<compile_context>
chip_gen: v7x
topology: tpu7x:2x2x1
jax: 0.10.0
libtpu: 0.0.40
codegen_flags: <defaults>
</compile_context>

<pallas_src>
import functools

import jax
import jax.numpy as jnp
from jax.experimental import pallas as pl
from jax.experimental.pallas import tpu as pltpu

LATENT_DIM = 64
HIDDEN = 128
OUT = 784            # 28 * 28


def _round_up(x, m):
    return (x + m - 1) // m * m


def generator_kernel(z_ref, w1_ref, b1_ref, w2_ref, b2_ref, o_ref):
    # First linear (MXU, f32 accumulation) + bias + ReLU (f32 elementwise tail).
    h = jnp.dot(z_ref[...], w1_ref[...], preferred_element_type=jnp.float32)
    h = jnp.maximum(h + b1_ref[...], 0.0)
    # Second linear (cast activations to weight dtype for the MXU) + bias + Tanh.
    y = jnp.dot(h.astype(w2_ref.dtype), w2_ref[...],
                preferred_element_type=jnp.float32)
    o_ref[...] = jnp.tanh(y + b2_ref[...]).astype(o_ref.dtype)


def prepare_params(w1_t, b1, w2_t, b2, compute_dtype=jnp.float32):
    """One-time per-model prep (hoisted out of the forward loop).

    Weights are pre-transposed to (in, out); they are cast to compute_dtype
    here.  Biases stay f32 because the elementwise tail runs in f32.
    """
    return (w1_t.astype(compute_dtype), b1.astype(jnp.float32),
            w2_t.astype(compute_dtype), b2.astype(jnp.float32))


def _pick_tile_b(b_pad, tile_b):
    # Round user tile to sublane multiple, cap it, and ensure >=2 grid steps
    # whenever possible so the "parallel" axis spans both v7x TensorCores.
    cap = max(8, _round_up(int(tile_b), 8))
    half = max(8, _round_up(pl.cdiv(b_pad, 2), 8))
    return min(cap, half)


def generator_forward(z, params, *, tile_b=1024, out_dtype=jnp.float32):
    """z: (B, LATENT_DIM).  params: output of prepare_params().
    Returns (B, 1, 28, 28) in out_dtype (matches torch .view(-1, 1, 28, 28))."""
    w1_c, b1_c, w2_c, b2_c = params
    compute_dtype = w1_c.dtype
    B = z.shape[0]

    # Pad batch only to a sublane multiple; a partial last grid block is masked
    # by Pallas (OOB output rows are dropped, so garbage rows never land).
    B_pad = _round_up(max(B, 1), 8)
    z_p = z if B_pad == B else jnp.pad(z, ((0, B_pad - B), (0, 0)))
    z_p = z_p.astype(compute_dtype)

    TILE_B = _pick_tile_b(B_pad, tile_b)
    grid = (pl.cdiv(B_pad, TILE_B),)

    in_itemsize = jnp.dtype(compute_dtype).itemsize
    out_itemsize = jnp.dtype(out_dtype).itemsize
    cost = pl.CostEstimate(
        flops=2 * B_pad * (LATENT_DIM * HIDDEN + HIDDEN * OUT),
        transcendentals=B_pad * OUT,
        bytes_accessed=(B_pad * LATENT_DIM * in_itemsize       # z
                        + LATENT_DIM * HIDDEN * in_itemsize    # w1
                        + HIDDEN * 4                           # b1
                        + HIDDEN * OUT * in_itemsize           # w2
                        + OUT * 4                              # b2
                        + B_pad * OUT * out_itemsize),         # out (dominant)
    )

    out = pl.pallas_call(
        generator_kernel,
        out_shape=jax.ShapeDtypeStruct((B_pad, OUT), out_dtype),
        grid=grid,
        in_specs=[
            pl.BlockSpec((TILE_B, LATENT_DIM), lambda i: (i, 0)),   # z tile
            pl.BlockSpec((LATENT_DIM, HIDDEN), lambda i: (0, 0)),   # w1 resident
            pl.BlockSpec((1, HIDDEN), lambda i: (0, 0)),            # b1 resident
            pl.BlockSpec((HIDDEN, OUT), lambda i: (0, 0)),          # w2 resident
            pl.BlockSpec((1, OUT), lambda i: (0, 0)),               # b2 resident
        ],
        out_specs=pl.BlockSpec((TILE_B, OUT), lambda i: (i, 0)),
        compiler_params=pltpu.CompilerParams(
            dimension_semantics=("parallel",)),
        cost_estimate=cost,
    )(z_p, w1_c, b1_c, w2_c, b2_c)

    # Drop padded rows (<=7) and view row-major to NCHW.
    return out[:B].reshape(-1, 1, 28, 28)


def init_params(key):
    """Deterministic init mimicking nn.Linear (uniform +- 1/sqrt(fan_in)).
    PyTorch weight is (out, in); we store transposed (in, out) so the kernel
    computes x @ W_t directly."""
    k1, k2, k3, k4 = jax.random.split(key, 4)
    bound1 = 1.0 / jnp.sqrt(LATENT_DIM)
    bound2 = 1.0 / jnp.sqrt(HIDDEN)
    w1_t = jax.random.uniform(k1, (LATENT_DIM, HIDDEN), jnp.float32, -bound1, bound1)
    b1 = jax.random.uniform(k2, (1, HIDDEN), jnp.float32, -bound1, bound1)
    w2_t = jax.random.uniform(k3, (HIDDEN, OUT), jnp.float32, -bound2, bound2)
    b2 = jax.random.uniform(k4, (1, OUT), jnp.float32, -bound2, bound2)
    return w1_t, b1, w2_t, b2


def _ref_forward(z, w1_t, b1, w2_t, b2):
    return jnp.tanh(jnp.maximum(z @ w1_t + b1, 0.0) @ w2_t + b2).reshape(-1, 1, 28, 28)


if __name__ == "__main__":
    key = jax.random.PRNGKey(0)
    kz, kp = jax.random.split(key)
    w1_t, b1, w2_t, b2 = init_params(kp)

    # One-time weight prep (f32 and bf16 variants), hoisted out of the forward.
    params_f32 = prepare_params(w1_t, b1, w2_t, b2, compute_dtype=jnp.float32)
    params_bf16 = prepare_params(w1_t, b1, w2_t, b2, compute_dtype=jnp.bfloat16)

    fwd = functools.partial(generator_forward, tile_b=1024)

    # Small batch (multiple of 8 sublanes).
    B = 8
    z = jax.random.normal(kz, (B, LATENT_DIM), jnp.float32)
    out = jax.block_until_ready(fwd(z, params_f32))
    ref = _ref_forward(z, w1_t, b1, w2_t, b2)
    assert out.shape == (B, 1, 28, 28), out.shape
    assert jnp.allclose(out, ref, atol=1e-5, rtol=1e-5)

    # Ragged batch (exercises the small row-pad + multi-step grid path).
    B2 = 10
    z2 = jax.random.normal(jax.random.fold_in(kz, 1), (B2, LATENT_DIM), jnp.float32)
    out2 = jax.block_until_ready(fwd(z2, params_f32))
    ref2 = _ref_forward(z2, w1_t, b1, w2_t, b2)
    assert out2.shape == (B2, 1, 28, 28), out2.shape
    assert jnp.allclose(out2, ref2, atol=1e-5, rtol=1e-5)

    # bf16 weight/activation compute + bf16 output (halves the dominant HBM
    # write stream); relaxed tolerance vs the f32 reference.
    out_bf16 = jax.block_until_ready(
        fwd(z, params_bf16, out_dtype=jnp.bfloat16))
    assert out_bf16.dtype == jnp.bfloat16
    assert jnp.allclose(out_bf16.astype(jnp.float32), ref, atol=2e-2, rtol=2e-2)

    print("KERNEL_OK")
</pallas_src>

<mosaic_0001>
module attributes {stable_mosaic.version = 11 : i64} {
  func.func @generator_kernel(%arg0: i32, %arg1: memref<8x64xf32, #tpu.memory_space<vmem>>, %arg2: memref<64x128xf32, #tpu.memory_space<vmem>>, %arg3: memref<1x128xf32, #tpu.memory_space<vmem>>, %arg4: memref<128x784xf32, #tpu.memory_space<vmem>>, %arg5: memref<1x784xf32, #tpu.memory_space<vmem>>, %arg6: memref<8x784xf32, #tpu.memory_space<vmem>>) attributes {dimension_semantics = [#tpu.dimension_semantics<parallel>], iteration_bounds = array<i64: 1>, scalar_prefetch = 0 : i64, scratch_operands = 0 : i64, tpu.core_type = #tpu.core_type<tc>, window_params = [{transform_indices = @transform_0, window_bounds = array<i64: 8, 64>}, {pipeline_mode = #tpu.pipeline_mode<synchronous>, transform_indices = @transform_1, window_bounds = array<i64: 64, 128>}, {pipeline_mode = #tpu.pipeline_mode<synchronous>, transform_indices = @transform_2, window_bounds = array<i64: 1, 128>}, {pipeline_mode = #tpu.pipeline_mode<synchronous>, transform_indices = @transform_3, window_bounds = array<i64: 128, 784>}, {pipeline_mode = #tpu.pipeline_mode<synchronous>, transform_indices = @transform_4, window_bounds = array<i64: 1, 784>}, {transform_indices = @transform_5, window_bounds = array<i64: 8, 784>}]} {
    %c0 = arith.constant 0 : index
    %c0_0 = arith.constant 0 : index
    %0 = vector.load %arg1[%c0, %c0_0] : memref<8x64xf32, #tpu.memory_space<vmem>>, vector<8x64xf32>
    %c0_1 = arith.constant 0 : index
    %c0_2 = arith.constant 0 : index
    %1 = vector.load %arg2[%c0_1, %c0_2] : memref<64x128xf32, #tpu.memory_space<vmem>>, vector<64x128xf32>
    %cst = arith.constant dense<0.000000e+00> : vector<8x128xf32>
    %2 = tpu.matmul %0, %1, %cst {dimension_numbers = #tpu.dot_dimension_numbers<[1], [0], [0], [1], [0, 0, 1, 1], [], []>} : vector<8x64xf32>, vector<64x128xf32>, vector<8x128xf32> -> vector<8x128xf32>
    %c0_3 = arith.constant 0 : index
    %c0_4 = arith.constant 0 : index
    %3 = vector.load %arg3[%c0_3, %c0_4] : memref<1x128xf32, #tpu.memory_space<vmem>>, vector<1x128xf32>
    %4 = vector.broadcast %3 : vector<1x128xf32> to vector<8x128xf32>
    %5 = arith.addf %2, %4 : vector<8x128xf32>
    %cst_5 = arith.constant 0.000000e+00 : f32
    %6 = vector.broadcast %cst_5 : f32 to vector<8x128xf32>
    %7 = arith.maximumf %5, %6 : vector<8x128xf32>
    %c0_6 = arith.constant 0 : index
    %c0_7 = arith.constant 0 : index
    %8 = vector.load %arg4[%c0_6, %c0_7] : memref<128x784xf32, #tpu.memory_space<vmem>>, vector<128x784xf32>
    %cst_8 = arith.constant dense<0.000000e+00> : vector<8x784xf32>
    %9 = tpu.matmul %7, %8, %cst_8 {dimension_numbers = #tpu.dot_dimension_numbers<[1], [0], [0], [1], [0, 0, 1, 1], [], []>} : vector<8x128xf32>, vector<128x784xf32>, vector<8x784xf32> -> vector<8x784xf32>
    %c0_9 = arith.constant 0 : index
    %c0_10 = arith.constant 0 : index
    %10 = vector.load %arg5[%c0_9, %c0_10] : memref<1x784xf32, #tpu.memory_space<vmem>>, vector<1x784xf32>
    %11 = vector.broadcast %10 : vector<1x784xf32> to vector<8x784xf32>
    %12 = arith.addf %9, %11 : vector<8x784xf32>
    %13 = math.tanh %12 : vector<8x784xf32>
    %c0_11 = arith.constant 0 : index
    %c0_12 = arith.constant 0 : index
    %14 = vector.load %arg6[%c0_11, %c0_12] : memref<8x784xf32, #tpu.memory_space<vmem>>, vector<8x784xf32>
    tpu.vector_store %arg6[%c0_11, %c0_12], %13 {strides = array<i32>} : memref<8x784xf32, #tpu.memory_space<vmem>>, vector<8x784xf32>,
    return
  }
  func.func @transform_0(%arg0: i32) -> (i32, i32) {
    %c0_i32 = arith.constant 0 : i32
    %c0_i32_0 = arith.constant 0 : i32
    return %arg0, %c0_i32 : i32, i32
  }
  func.func @transform_1(%arg0: i32) -> (i32, i32) {
    %c0_i32 = arith.constant 0 : i32
    %c0_i32_0 = arith.constant 0 : i32
    %c0_i32_1 = arith.constant 0 : i32
    return %c0_i32, %c0_i32_0 : i32, i32
  }
  func.func @transform_2(%arg0: i32) -> (i32, i32) {
    %c0_i32 = arith.constant 0 : i32
    %c0_i32_0 = arith.constant 0 : i32
    %c0_i32_1 = arith.constant 0 : i32
    return %c0_i32, %c0_i32_0 : i32, i32
  }
  func.func @transform_3(%arg0: i32) -> (i32, i32) {
    %c0_i32 = arith.constant 0 : i32
    %c0_i32_0 = arith.constant 0 : i32
    %c0_i32_1 = arith.constant 0 : i32
    return %c0_i32, %c0_i32_0 : i32, i32
  }
  func.func @transform_4(%arg0: i32) -> (i32, i32) {
    %c0_i32 = arith.constant 0 : i32
    %c0_i32_0 = arith.constant 0 : i32
    %c0_i32_1 = arith.constant 0 : i32
    return %c0_i32, %c0_i32_0 : i32, i32
  }
  func.func @transform_5(%arg0: i32) -> (i32, i32) {
    %c0_i32 = arith.constant 0 : i32
    %c0_i32_0 = arith.constant 0 : i32
    return %arg0, %c0_i32 : i32, i32
  }
}

</mosaic_0001>

<bundles_post_ra>
// kernel: tpu_custom_call.1
= control target key start
LH: loop header
LB: loop body
LE: loop exit
PB: predicated region body
PF: predicated region fallthrough
CT: control target
= control target key end

     0   :  { %v829_v3 = vmov 0.0|0.0   ;;  %vm830_vm0 = vmmov 0   ;;  %v831_v6 = vmov 0.0   ;;  %vm37_vm1 = vcmask 523264   ;;  %s1270_s0 = inlined_call_operand.vmem [shape: f32[8,64], index: 0, kind: input, shape index: {}]   ;;  %s1271_s1 = inlined_call_operand.vmem [shape: f32[64,128], index: 1, kind: input, shape index: {}]   ;;  %s1272_s2 = inlined_call_operand.vmem [shape: f32[1,128], index: 2, kind: input, shape index: {}]   ;;  %s1273_s3 = inlined_call_operand.vmem [shape: f32[128,784], index: 3, kind: input, shape index: {}]   ;;  %s1274_s4 = inlined_call_operand.vmem [shape: f32[1,784], index: 4, kind: input, shape index: {}]   ;;  %s1275_s5 = inlined_call_operand.hbm [shape: f32[8,784], index: 5, kind: output, shape index: {}]  }
   0x1   :  { %v22_v0 = vld [vmem:[%s1271_s1] sm:$0xff]  ;;  %v23_v1 = vld [vmem:[%s1271_s1 + $0x8] sm:$0xff]  ;;  %v24_v2 = vld [vmem:[%s1271_s1 + $0x10] sm:$0xff]  ;;  %655 = vmatprep.subr.bf16.mxu0 %v829_v3  ;;  %617 = vmatprep.mubr.msk.f32.mxu0 %vm830_vm0, %v831_v6 }
   0x2   :  { %v656_v4 = vpack.c.bf16 %v23_v1, %v22_v0  ;;  %v25_v5 = vld [vmem:[%s1271_s1 + $0x18] sm:$0xff]  ;;  %325 = vmatprep.mubr.f32.mxu1 %v831_v6  ;;  %v26_v8 = vld [vmem:[%s1271_s1 + $0x20] sm:$0xff]  ;;  %v113_v9 = vld [vmem:[%s1273_s3 + $0x8] sm:$0xff] }
   0x3   :  { %v659_v7 = vpack.c.bf16 %v25_v5, %v24_v2  ;;  %v120_v10 = vld [vmem:[%s1273_s3 + $0x40] sm:$0xff]  ;;  %v27_v11 = vld [vmem:[%s1271_s1 + $0x28] sm:$0xff]  ;;  %v119_v14 = vld [vmem:[%s1273_s3 + $0x38] sm:$0xff] }
   0x4   :  { %657 = vmatpush3.bf16.msra.mxu0 %v656_v4  ;;  %v667_v12 = vpack.c.bf16 %v120_v10, %v113_v9  ;;  %v112_v13 = vld [vmem:[%s1273_s3] sm:$0xff]  ;;  %v127_v16 = vld [vmem:[%s1273_s3 + $0x78] sm:$0xff]  ;;  %v134_v17 = vld [vmem:[%s1273_s3 + $0xb0] sm:$0xff]  ;;  %v662_v18 = vpack.c.bf16 %v27_v11, %v26_v8 }
   0x5   :  { %658 = vmatprep.subr.bf16.mxu0 %v829_v3  ;;  %v669_v15 = vpack.c.bf16 %v119_v14, %v112_v13  ;;  %v28_v19 = vld [vmem:[%s1271_s1 + $0x30] sm:$0xff]  ;;  %v671_v20 = vpack.c.bf16 %v134_v17, %v127_v16  ;;  %v133_v22 = vld [vmem:[%s1273_s3 + $0xa8] sm:$0xff]  ;;  %v29_v23 = vld [vmem:[%s1271_s1 + $0x38] sm:$0xff] }
   0x6   :  { %668 = vmatprep.subr.bf16.mxu1 %v667_v12  ;;  %v126_v21 = vld [vmem:[%s1273_s3 + $0x70] sm:$0xff]  ;;  %v141_v25 = vld [vmem:[%s1273_s3 + $0xe8] sm:$0xff]  ;;  %v148_v26 = vld [vmem:[%s1273_s3 + $0x120] sm:$0xff]  ;;  %v665_v32 = vpack.c.bf16 %v29_v23, %v28_v19 }
   0x7   :  { %670 = vmatpush1.bf16.msra.mxu1 %v669_v15  ;;  %v673_v24 = vpack.c.bf16 %v133_v22, %v126_v21  ;;  %v115_v27 = vld [vmem:[%s1273_s3 + $0x18] sm:$0xff]  ;;  %v122_v28 = vld [vmem:[%s1273_s3 + $0x50] sm:$0xff]  ;;  %v675_v29 = vpack.c.bf16 %v148_v26, %v141_v25  ;;  %v140_v30 = vld [vmem:[%s1273_s3 + $0xe0] sm:$0xff] }
   0x8   :  { %660 = vmatpush3.bf16.msra.mxu0 %v659_v7  ;;  %672 = vmatprep.subr.bf16.mxu1 %v671_v20  ;;  %v147_v31 = vld [vmem:[%s1273_s3 + $0x118] sm:$0xff]  ;;  %v114_v33 = vld [vmem:[%s1273_s3 + $0x10] sm:$0xff]  ;;  %v699_v37 = vpack.c.bf16 %v122_v28, %v115_v27  ;;  %v121_v38 = vld [vmem:[%s1273_s3 + $0x48] sm:$0xff] }
   0x9   :  { %661 = vmatprep.subr.bf16.mxu0 %v829_v3  ;;  %v677_v34 = vpack.c.bf16 %v147_v31, %v140_v30  ;;  %v155_v35 = vld [vmem:[%s1273_s3 + $0x158] sm:$0xff]  ;;  %v162_v36 = vld [vmem:[%s1273_s3 + $0x190] sm:$0xff]  ;;  %v161_v41 = vld [vmem:[%s1273_s3 + $0x188] sm:$0xff]  ;;  %v701_v47 = vpack.c.bf16 %v121_v38, %v114_v33 }
   0xa   :  { %v679_v39 = vpack.c.bf16 %v162_v36, %v155_v35  ;;  %v154_v40 = vld [vmem:[%s1273_s3 + $0x150] sm:$0xff]  ;;  %v129_v42 = vld [vmem:[%s1273_s3 + $0x88] sm:$0xff]  ;;  %v136_v43 = vld [vmem:[%s1273_s3 + $0xc0] sm:$0xff] }
   0xb   :  { %674 = vmatpush1.bf16.msra.mxu1 %v673_v24  ;;  %v169_v44 = vld [vmem:[%s1273_s3 + $0x1c8] sm:$0xff]  ;;  %v176_v45 = vld [vmem:[%s1273_s3 + $0x200] sm:$0xff]  ;;  %v135_v49 = vld [vmem:[%s1273_s3 + $0xb8] sm:$0xff]  ;;  %v681_v50 = vpack.c.bf16 %v161_v41, %v154_v40  ;;  %v703_v51 = vpack.c.bf16 %v136_v43, %v129_v42 }
   0xc   :  { %663 = vmatpush3.bf16.msra.mxu0 %v662_v18  ;;  %676 = vmatprep.subr.bf16.mxu1 %v675_v29  ;;  %v21_v46 = vld [vmem:[%s1270_s0] sm:$0xff]  ;;  %v143_v52 = vld [vmem:[%s1273_s3 + $0xf8] sm:$0xff]  ;;  %v683_v53 = vpack.c.bf16 %v176_v45, %v169_v44  ;;  %v150_v56 = vld [vmem:[%s1273_s3 + $0x130] sm:$0xff] }
   0xd   :  { %664 = vmatprep.subr.bf16.mxu0 %v829_v3  ;;  %v128_v48 = vld [vmem:[%s1273_s3 + $0x80] sm:$0xff]  ;;  %v175_v55 = vld [vmem:[%s1273_s3 + $0x1f8] sm:$0xff]  ;;  %v190_v58 = vld [vmem:[%s1273_s3 + $0x270] sm:$0xff]  ;;  %v707_v63 = vpack.c.bf16 %v150_v56, %v143_v52 }
   0xe   :  { %v168_v54 = vld [vmem:[%s1273_s3 + $0x1c0] sm:$0xff]  ;;  %v183_v57 = vld [vmem:[%s1273_s3 + $0x238] sm:$0xff]  ;;  %v705_v59 = vpack.c.bf16 %v135_v49, %v128_v48  ;;  %v142_v60 = vld [vmem:[%s1273_s3 + $0xf0] sm:$0xff] }
   0xf   :  { %678 = vmatpush1.bf16.msra.mxu1 %v677_v34  ;;  %v149_v61 = vld [vmem:[%s1273_s3 + $0x128] sm:$0xff]  ;;  %v685_v62 = vpack.c.bf16 %v175_v55, %v168_v54  ;;  %v687_v1 = vpack.c.bf16 %v190_v58, %v183_v57  ;;  %v182_v2 = vld [vmem:[%s1273_s3 + $0x230] sm:$0xff]  ;;  %v164_v5 = vld [vmem:[%s1273_s3 + $0x1a0] sm:$0xff] }
  0x10   :  { %666 = vmatpush3.bf16.msra.mxu0 %v665_v32  ;;  %680 = vmatprep.subr.bf16.mxu1 %v679_v39  ;;  %v157_v0 = vld [vmem:[%s1273_s3 + $0x168] sm:$0xff]  ;;  %v204_v8 = vld [vmem:[%s1273_s3 + $0x2e0] sm:$0xff] }
  0x11   :  { %700 = vmatprep.subr.bf16.mxu0 %v699_v37  ;;  %v189_v4 = vld [vmem:[%s1273_s3 + $0x268] sm:$0xff] }
  0x12   :  { %v197_v7 = vld [vmem:[%s1273_s3 + $0x2a8] sm:$0xff] }
  0x13   :  { %618 = vmatmul.mubr.msk.f32.vlgmr.msra.gmra.mrb[0].mxu0 %vm37_vm1, %v21_v46  ;;  %682 = vmatpush1.bf16.msra.mxu1 %v681_v50 }
  0x14   :  { %702 = vmatpush1.bf16.msra.mxu0 %v701_v47  ;;  %684 = vmatprep.subr.bf16.mxu1 %v683_v53 }
  0x15   :  { %704 = vmatprep.subr.bf16.mxu0 %v703_v51  ;;  %396 = vmatprep.mubr.f32.mxu0 %v831_v6 }
  0x16   :  { %10 = vsyncpa [#allocation3], 0  ;;  %v709_v9 = vpack.c.bf16 %v149_v61, %v142_v60  ;;  %v156_v10 = vld [vmem:[%s1273_s3 + $0x160] sm:$0xff]  ;;  %v689_v11 = vpack.c.bf16 %v189_v4, %v182_v2  ;;  %v711_v12 = vpack.c.bf16 %v164_v5, %v157_v0  ;;  %v163_v13 = vld [vmem:[%s1273_s3 + $0x198] sm:$0xff]  ;;  %v691_v14 = vpack.c.bf16 %v204_v8, %v197_v7 }
  0x17   :  { %686 = vmatpush1.bf16.msra.mxu1 %v685_v62  ;;  %v196_v15 = vld [vmem:[%s1273_s3 + $0x2a0] sm:$0xff]  ;;  %v203_v16 = vld [vmem:[%s1273_s3 + $0x2d8] sm:$0xff]  ;;  %v178_v18 = vld [vmem:[%s1273_s3 + $0x210] sm:$0xff]  ;;  %v713_v19 = vpack.c.bf16 %v163_v13, %v156_v10  ;;  %vm557_vm2 = vcmask 130048  }
  0x18   :  { %706 = vmatpush1.bf16.msra.mxu0 %v705_v59  ;;  %688 = vmatprep.subr.bf16.mxu1 %v687_v1  ;;  %v171_v17 = vld [vmem:[%s1273_s3 + $0x1d8] sm:$0xff]  ;;  %v693_v20 = vpack.c.bf16 %v203_v16, %v196_v15  ;;  %v170_v22 = vld [vmem:[%s1273_s3 + $0x1d0] sm:$0xff]  ;;  %v177_v23 = vld [vmem:[%s1273_s3 + $0x208] sm:$0xff] }
  0x19   :  { %708 = vmatprep.subr.bf16.mxu0 %v707_v63  ;;  %v715_v21 = vpack.c.bf16 %v178_v18, %v171_v17  ;;  %v185_v24 = vld [vmem:[%s1273_s3 + $0x248] sm:$0xff]  ;;  %v192_v25 = vld [vmem:[%s1273_s3 + $0x280] sm:$0xff]  ;;  %v717_v26 = vpack.c.bf16 %v177_v23, %v170_v22  ;;  %v191_v29 = vld [vmem:[%s1273_s3 + $0x278] sm:$0xff] }
  0x1a   :  { %v719_v27 = vpack.c.bf16 %v192_v25, %v185_v24  ;;  %v184_v28 = vld [vmem:[%s1273_s3 + $0x240] sm:$0xff]  ;;  %v199_v30 = vld [vmem:[%s1273_s3 + $0x2b8] sm:$0xff]  ;;  %v206_v31 = vld [vmem:[%s1273_s3 + $0x2f0] sm:$0xff] }
  0x1b   :  { %690 = vmatpush1.bf16.msra.mxu1 %v689_v11  ;;  %v721_v32 = vpack.c.bf16 %v191_v29, %v184_v28  ;;  %v723_v33 = vpack.c.bf16 %v206_v31, %v199_v30  ;;  %v198_v34 = vld [vmem:[%s1273_s3 + $0x2b0] sm:$0xff]  ;;  %v205_v35 = vld [vmem:[%s1273_s3 + $0x2e8] sm:$0xff]  ;;  %v211_v37 = vld [vmem:[%s1273_s3 + $0x318] sm:$0xff] }
  0x1c   :  { %710 = vmatpush1.bf16.msra.mxu0 %v709_v9  ;;  %692 = vmatprep.subr.bf16.mxu1 %v691_v14  ;;  %v725_v36 = vpack.c.bf16 %v205_v35, %v198_v34  ;;  %v218_v38 = vld [vmem:[%s1273_s3 + $0x350] sm:$0xff]  ;;  %v213_v39 = vld [vmem:[%s1273_s3 + $0x328] sm:$0xff]  ;;  %v220_v41 = vld [vmem:[%s1273_s3 + $0x360] sm:$0xff] }
  0x1d   :  { %712 = vmatprep.subr.bf16.mxu0 %v711_v12  ;;  %v695_v40 = vpack.c.bf16 %v218_v38, %v211_v37  ;;  %v210_v42 = vld [vmem:[%s1273_s3 + $0x310] sm:$0xff]  ;;  %v217_v43 = vld [vmem:[%s1273_s3 + $0x348] sm:$0xff]  ;;  %v727_v44 = vpack.c.bf16 %v220_v41, %v213_v39  ;;  %v212_v46 = vld [vmem:[%s1273_s3 + $0x320] sm:$0xff] }
  0x1e   :  { %v697_v45 = vpack.c.bf16 %v217_v43, %v210_v42  ;;  %v219_v47 = vld [vmem:[%s1273_s3 + $0x358] sm:$0xff]  ;;  %v117_v49 = vld [vmem:[%s1273_s3 + $0x28] sm:$0xff]  ;;  %v124_v50 = vld [vmem:[%s1273_s3 + $0x60] sm:$0xff] }
  0x1f   :  { %694 = vmatpush1.bf16.msra.mxu1 %v693_v20  ;;  %v729_v48 = vpack.c.bf16 %v219_v47, %v212_v46  ;;  %v731_v51 = vpack.c.bf16 %v124_v50, %v117_v49  ;;  %v573_v52 = vld [vmem:[%s1272_s2] ss:$0 sm:$0xff]  ;;  %v123_v54 = vld [vmem:[%s1273_s3 + $0x58] sm:$0xff]  ;;  %v118_v55 = vld [vmem:[%s1273_s3 + $0x30] sm:$0xff] }
  0x20   :  { %714 = vmatpush1.bf16.msra.mxu0 %v713_v19  ;;  %696 = vmatprep.subr.bf16.mxu1 %v695_v40  ;;  %v116_v53 = vld [vmem:[%s1273_s3 + $0x20] sm:$0xff]  ;;  %v125_v56 = vld [vmem:[%s1273_s3 + $0x68] sm:$0xff]  ;;  %v131_v58 = vld [vmem:[%s1273_s3 + $0x98] sm:$0xff] }
  0x21   :  { %716 = vmatprep.subr.bf16.mxu0 %v715_v21  ;;  %v138_v59 = vld [vmem:[%s1273_s3 + $0xd0] sm:$0xff]  ;;  %v733_v62 = vpack.c.bf16 %v123_v54, %v116_v53  ;;  %v764_v63 = vpack.c.bf16 %v125_v56, %v118_v55  ;;  %v137_v4 = vld [vmem:[%s1273_s3 + $0xc8] sm:$0xff]  ;;  %v132_v5 = vld [vmem:[%s1273_s3 + $0xa0] sm:$0xff] }
  0x22   :  { %v130_v0 = vld [vmem:[%s1273_s3 + $0x90] sm:$0xff]  ;;  %v735_v2 = vpack.c.bf16 %v138_v59, %v131_v58  ;;  %v139_v7 = vld [vmem:[%s1273_s3 + $0xd8] sm:$0xff]  ;;  %v145_v8 = vld [vmem:[%s1273_s3 + $0x108] sm:$0xff] }
  0x23   :  { %698 = vmatpush1.bf16.msra.mxu1 %v697_v45  ;;  %v152_v9 = vld [vmem:[%s1273_s3 + $0x140] sm:$0xff]  ;;  %v737_v10 = vpack.c.bf16 %v137_v4, %v130_v0  ;;  %v767_v11 = vpack.c.bf16 %v139_v7, %v132_v5  ;;  %v151_v14 = vld [vmem:[%s1273_s3 + $0x138] sm:$0xff]  ;;  %v146_v15 = vld [vmem:[%s1273_s3 + $0x110] sm:$0xff] }
  0x24   :  { %718 = vmatpush1.bf16.msra.mxu0 %v717_v26  ;;  %732 = vmatprep.subr.bf16.mxu1 %v731_v51  ;;  %v144_v12 = vld [vmem:[%s1273_s3 + $0x100] sm:$0xff]  ;;  %v739_v13 = vpack.c.bf16 %v152_v9, %v145_v8  ;;  %v153_v16 = vld [vmem:[%s1273_s3 + $0x148] sm:$0xff]  ;;  %v159_v17 = vld [vmem:[%s1273_s3 + $0x178] sm:$0xff] }
  0x25   :  { %720 = vmatprep.subr.bf16.mxu0 %v719_v27  ;;  %v166_v18 = vld [vmem:[%s1273_s3 + $0x1b0] sm:$0xff]  ;;  %v741_v19 = vpack.c.bf16 %v151_v14, %v144_v12  ;;  %v770_v20 = vpack.c.bf16 %v153_v16, %v146_v15  ;;  %v165_v23 = vld [vmem:[%s1273_s3 + $0x1a8] sm:$0xff]  ;;  %v167_v24 = vld [vmem:[%s1273_s3 + $0x1b8] sm:$0xff] }
  0x26   :  { %v158_v21 = vld [vmem:[%s1273_s3 + $0x170] sm:$0xff]  ;;  %v743_v22 = vpack.c.bf16 %v166_v18, %v159_v17  ;;  %v173_v25 = vld [vmem:[%s1273_s3 + $0x1e8] sm:$0xff]  ;;  %v180_v26 = vld [vmem:[%s1273_s3 + $0x220] sm:$0xff] }
  0x27   :  { %v745_v27 = vpack.c.bf16 %v165_v23, %v158_v21  ;;  %v172_v29 = vld [vmem:[%s1273_s3 + $0x1e0] sm:$0xff]  ;;  %v747_v30 = vpack.c.bf16 %v180_v26, %v173_v25  ;;  %v179_v31 = vld [vmem:[%s1273_s3 + $0x218] sm:$0xff]  ;;  %v194_v35 = vld [vmem:[%s1273_s3 + $0x290] sm:$0xff] }
  0x28   :  { %722 = vmatpush1.bf16.msra.mxu0 %v721_v32  ;;  %v174_v32 = vld [vmem:[%s1273_s3 + $0x1f0] sm:$0xff]  ;;  %v187_v34 = vld [vmem:[%s1273_s3 + $0x258] sm:$0xff]  ;;  %v193_v40 = vld [vmem:[%s1273_s3 + $0x288] sm:$0xff] }
  0x29   :  { %724 = vmatprep.subr.bf16.mxu0 %v723_v33  ;;  %v181_v33 = vld [vmem:[%s1273_s3 + $0x228] sm:$0xff]  ;;  %v186_v38 = vld [vmem:[%s1273_s3 + $0x250] sm:$0xff]  ;;  %v751_v39 = vpack.c.bf16 %v194_v35, %v187_v34  ;;  %v188_v41 = vld [vmem:[%s1273_s3 + $0x260] sm:$0xff] }
  0x2a   :  { %v776_v37 = vpack.c.bf16 %v181_v33, %v174_v32  ;;  %v195_v42 = vld [vmem:[%s1273_s3 + $0x298] sm:$0xff]  ;;  %v201_v43 = vld [vmem:[%s1273_s3 + $0x2c8] sm:$0xff]  ;;  %v753_v45 = vpack.c.bf16 %v193_v40, %v186_v38  ;;  %v200_v47 = vld [vmem:[%s1273_s3 + $0x2c0] sm:$0xff] }
  0x2b   :  { %v779_v46 = vpack.c.bf16 %v195_v42, %v188_v41  ;;  %v207_v49 = vld [vmem:[%s1273_s3 + $0x2f8] sm:$0xff]  ;;  %v202_v50 = vld [vmem:[%s1273_s3 + $0x2d0] sm:$0xff]  ;;  %v209_v51 = vld [vmem:[%s1273_s3 + $0x308] sm:$0xff] }
  0x2c   :  { %726 = vmatpush1.bf16.msra.mxu0 %v725_v36  ;;  %v749_v36 = vpack.c.bf16 %v179_v31, %v172_v29  ;;  %v222_v53 = vld [vmem:[%s1273_s3 + $0x370] sm:$0xff]  ;;  %v757_v54 = vpack.c.bf16 %v207_v49, %v200_v47  ;;  %v782_v55 = vpack.c.bf16 %v209_v51, %v202_v50  ;;  %v221_v58 = vld [vmem:[%s1273_s3 + $0x368] sm:$0xff]  ;;  %v216_v59 = vld [vmem:[%s1273_s3 + $0x340] sm:$0xff] }
  0x2d   :  { %728 = vmatprep.subr.bf16.mxu0 %v727_v44  ;;  %v208_v44 = vld [vmem:[%s1273_s3 + $0x300] sm:$0xff]  ;;  %v214_v56 = vld [vmem:[%s1273_s3 + $0x330] sm:$0xff] }
  0x2e   :  { %v224_v5 = vld [vmem:[%s1274_s4] sm:$0x7f] }
  0x30   :  { %730 = vmatpush1.bf16.msra.mxu0 %v729_v48  ;;  %v755_v48 = vpack.c.bf16 %v208_v44, %v201_v43 }
  0x31   :  { %763 = vmatprep.subr.bf16.mxu0 %v829_v3 }
  0xe6   :  { %v107_v57 = vpop.f32.mrb[0].mxu0 }
  0xe7   :  { %v108_v60 = vadd.f32 %v573_v52, %v107_v57  ;;  %v619_v61 = vpop.f32.mrb[1].mxu0  ;;  %v215_v52 = vld [vmem:[%s1273_s3 + $0x338] sm:$0xff] }
  0xe8   :  { %v759_v57 = vpack.c.bf16 %v222_v53, %v215_v52  ;;  %v761_v61 = vpack.c.bf16 %v221_v58, %v214_v56 }
  0xe9   :  { %v1122_v1 = vmax.f32 %v108_v60, 0.0  ;;  %v223_v60 = vld [vmem:[%s1273_s3 + $0x378] sm:$0xff] }
  0xeb   :  { %326 = vmatmul.mubr.f32.vlgmr.msra.gmra.mrb[0].mxu1 %v1122_v1  ;;  %397 = vmatmul.mubr.f32.vlgmr.msra.gmra.mrb[2].mxu0 %v1122_v1 }
  0xec   :  { %734 = vmatpush1.bf16.msra.mxu1 %v733_v62  ;;  %765 = vmatpush3.bf16.msra.mxu0 %v764_v63  ;;  %v785_v62 = vpack.c.bf16 %v223_v60, %v216_v59  ;;  %v226_v63 = vlaneseq }
  0xed   :  { %736 = vmatprep.subr.bf16.mxu1 %v735_v2  ;;  %766 = vmatprep.subr.bf16.mxu0 %v829_v3 }
  0xee   :  { %467 = vmatprep.mubr.f32.mxu1 %v831_v6  ;;  %652 = vmatprep.mubr.msk.f32.mxu0 %vm830_vm0, %v831_v6  ;;  %v160_v6 = vld [vmem:[%s1273_s3 + $0x180] sm:$0xff]  ;;  %v227_v0 = vshrl.u32 %v226_v63, 7  ;;  %s832_s3 = smov [#allocation2]  }
  0xef   :  { %v773_v28 = vpack.c.bf16 %v167_v24, %v160_v6  ;;  %s565_s4 = sshll.u32 %s832_s3, 4  ;;  %s566_s4 = int_to_ptr.vmem [resolvable:$true] %s565_s4 }
  0xf0   :  { %738 = vmatpush1.bf16.msra.mxu1 %v737_v10  ;;  %768 = vmatpush3.bf16.msra.mxu0 %v767_v11  ;;  %v228_v2 = vsub.s32 0, %v227_v0  ;;  %v236_v4 = vsub.s32 2, %v227_v0  ;;  %v232_v7 = vsub.s32 1, %v227_v0  ;;  %v240_v8 = vsub.s32 3, %v227_v0  ;;  %s805_s2 = scalar_lea.vmem %s566_s4, 896  ;;  %p810_p1 = scmp.lt.s32.totalorder %s566_s4, %s566_s4 }
  0xf1   :  { %740 = vmatprep.subr.bf16.mxu1 %v739_v13  ;;  %769 = vmatprep.subr.bf16.mxu0 %v829_v3  ;;  %v244_v23 = vsub.s32 4, %v227_v0  ;;  %v252_v6 = vsub.s32 6, %v227_v0  ;;  %v248_v24 = vsub.s32 5, %v227_v0  ;;  %p806_p0 = scmp.ne.s32.totalorder %s566_s4, %s805_s2  ;;  %p811_p2 = scmp.lt.s32.totalorder %s805_s2, %s805_s2 }
  0xf2   :  { %v229_v9 = vrot.slane %v224_v5, %v228_v2  ;;  %v237_v10 = vrot.slane %v224_v5, %v236_v4  ;;  %v233_v11 = vrot.slane %v224_v5, %v232_v7 }
  0xf3   :  { %v245_v25 = vrot.slane %v224_v5, %v244_v23  ;;  %v253_v26 = vrot.slane %v224_v5, %v252_v6  ;;  %p812_p3 = por %p811_p2, %p810_p1 }
  0xf4   :  { %742 = vmatpush1.bf16.msra.mxu1 %v741_v19  ;;  %771 = vmatpush3.bf16.msra.mxu0 %v770_v20 }
  0xf5   :  { %744 = vmatprep.subr.bf16.mxu1 %v743_v22  ;;  %772 = vmatprep.subr.bf16.mxu0 %v829_v3  ;;  %p813_p4 = pnand %p812_p3, %p806_p0 }
  0xf8   :  { %746 = vmatpush1.bf16.msra.mxu1 %v745_v27  ;;  %774 = vmatpush3.bf16.msra.mxu0 %v773_v28  ;;  %v249_v27 = vrot.slane %v224_v5, %v248_v24 }
  0xf9   :  { %748 = vmatprep.subr.bf16.mxu1 %v747_v30  ;;  %775 = vmatprep.subr.bf16.mxu0 %v829_v3 }
  0xfc   :  { %750 = vmatpush1.bf16.msra.mxu1 %v749_v36  ;;  %777 = vmatpush3.bf16.msra.mxu0 %v776_v37 }
  0xfd   :  { %752 = vmatprep.subr.bf16.mxu1 %v751_v39  ;;  %778 = vmatprep.subr.bf16.mxu0 %v829_v3 }
 0x100   :  { %754 = vmatpush1.bf16.msra.mxu1 %v753_v45  ;;  %780 = vmatpush3.bf16.msra.mxu0 %v779_v46 }
 0x101   :  { %756 = vmatprep.subr.bf16.mxu1 %v755_v48  ;;  %781 = vmatprep.subr.bf16.mxu0 %v829_v3 }
 0x104   :  { %758 = vmatpush1.bf16.msra.mxu1 %v757_v54  ;;  %783 = vmatpush3.bf16.msra.mxu0 %v782_v55 }
 0x105   :  { %760 = vmatprep.subr.bf16.mxu1 %v759_v57  ;;  %784 = vmatprep.subr.bf16.mxu0 %v829_v3  ;;  %v241_v3 = vrot.slane %v224_v5, %v240_v8 }
 0x108   :  { %762 = vmatpush1.bf16.msra.mxu1 %v761_v61  ;;  %786 = vmatpush3.bf16.msra.mxu0 %v785_v62 }
 0x10b   :  { %468 = vmatmul.mubr.f32.vlgmr.msra.gmra.mrb[2].mxu1 %v1122_v1  ;;  %653 = vmatmul.mubr.f32.vlgmr.msra.gmra.mrb[4].mxu0 %v1122_v1 }
 0x1be   :  { %v327_v12 = vpop.f32.mrb[0].mxu1  ;;  %v398_v13 = vpop.f32.mrb[2].mxu0 }
 0x1bf   :  { %v328_v14 = vadd.f32 %v327_v12, %v229_v9  ;;  %v399_v15 = vadd.f32 %v398_v13, %v237_v10  ;;  %v329_v16 = vpop.f32.mrb[1].mxu1  ;;  %v400_v1 = vpop.f32.mrb[3].mxu0 }
 0x1c0   :  { %v330_v17 = vadd.f32 %v329_v16, %v233_v11  ;;  %v401_v18 = vadd.f32 %v400_v1, %v241_v3 }
 0x1c1   :  { %791 = vtanh.f32 %v328_v14 }
 0x1c2   :  { %793 = vtanh.f32 %v399_v15 }
 0x1c3   :  { %795 = vtanh.f32 %v330_v17 }
 0x1c4   :  { %797 = vtanh.f32 %v401_v18 }
 0x1cb   :  { %v792_v19 = vpop.eup %791 }
 0x1cc   :  { %v794_v20 = vpop.eup %793  ;;  %551 = vst [vmem:[#allocation2] sm:$0xff] %v792_v19 }
 0x1cd   :  { %v796_v21 = vpop.eup %795  ;;  %553 = vst [vmem:[#allocation2 + $0x10] sm:$0xff] %v794_v20 }
 0x1ce   :  { %v798_v22 = vpop.eup %797  ;;  %552 = vst [vmem:[#allocation2 + $0x8] sm:$0xff] %v796_v21 }
 0x1cf   :  { %554 = vst [vmem:[#allocation2 + $0x18] sm:$0xff] %v798_v22 }
 0x1de   :  { %v469_v28 = vpop.f32.mrb[2].mxu1  ;;  %v540_v29 = vpop.f32.mrb[4].mxu0 }
 0x1df   :  { %v470_v30 = vadd.f32 %v469_v28, %v245_v25  ;;  %v541_v31 = vadd.f32 %v540_v29, %v253_v26  ;;  %v471_v32 = vpop.f32.mrb[3].mxu1  ;;  %v654_v33 = vpop.f32.mrb[5].mxu0 }
 0x1e0   :  { %v472_v34 = vadd.f32 %v471_v32, %v249_v27 }
 0x1e1   :  { %799 = vtanh.f32 %v470_v30 }
 0x1e2   :  { %801 = vtanh.f32 %v541_v31 }
 0x1e3   :  { %803 = vtanh.f32 %v472_v34 }
 0x1eb   :  { %v800_v35 = vpop.eup %799 }
 0x1ec   :  { %v802_v36 = vpop.eup %801  ;;  %555 = vst [vmem:[#allocation2 + $0x20] sm:$0xff] %v800_v35 }
 0x1ed   :  { %v804_v37 = vpop.eup %803  ;;  %558 = vst.msk [vmem:[#allocation2 + $0x30] sm:$0xff] %vm557_vm2, %v802_v36 }
 0x1ee   :  { %556 = vst [vmem:[#allocation2 + $0x28] sm:$0xff] %v804_v37 }
 0x1ef   :  { %816 = shalt.err (!%p813_p4)
}
 0x1f0   :  { %s817_s23 = scalar_lea.hbm %s1275_s5, 896 }
 0x1f1   :  { %p818_p5 = scmp.ne.s32.totalorder %s1275_s5, %s817_s23  ;;  %p821_p6 = scmp.lt.u32.totalorder %s817_s23, %s1275_s5 }
 0x1f3   :  { %p823_p7 = pnand %p821_p6, %p818_p5 }
 0x1f5   :  { %826 = shalt.err (!%p823_p7)
}
 0x1f6   :  { %568 = dma.vmem_to_hbm [thread:$0]  %s566_s4, 896, %s1275_s5, [#allocation3]  }
 0x1f7   :  { %827 = dma.done.wait [#allocation3], 896  }
 0x1f8   :  { %828 = vsyncadd [#allocation3], 4294966400 }
 0x1f9   :  { %572 = vsyncpa [#allocation3], 1 }

</bundles_post_ra>
